<compile_context>
chip_gen: v7x
topology: tpu7x:2x2x1
jax: 0.10.0
libtpu: 0.0.40
codegen_flags: <defaults>
</compile_context>

<pallas_src>
import math

import jax
import jax.numpy as jnp
import numpy as np
from jax.experimental import pallas as pl
from jax.experimental.pallas import tpu as pltpu


# ----------------------------------------------------------------------------
# Pallas kernel: fused depthwise conv (out_mask) + mask-weighted image conv
#                + channel reduction (construct_image), reassociated.
# ----------------------------------------------------------------------------
def _make_kernel(Nb, C, NC, K, Wp, Lp):
    K2 = K * K
    # tap t = (dy, dx) -> flat shift dy*Wp + dx on the row-major padded plane.
    shifts = [dy * Wp + dx for dy in range(K) for dx in range(K)]

    def _roll(x, s):
        # result[.., j] = x[.., j + s]  (wraparound only lands in discarded lanes)
        if s == 0:
            return x
        return pltpu.roll(x, shift=(Lp - s) % Lp, axis=1)     # XLU lane rotate

    def kernel(w_ref, wt_ref, x_ref, pred_ref, imroll_ref):
        # w_ref     : VMEM (NC, K2)        depthwise taps, row c = mask channel c
        # wt_ref    : VMEM (K2, NC)        same taps, transposed (for the MXU dot)
        # x_ref     : VMEM (Nb, NC+C, Lp)  stacked [m_mask ; image] flat planes
        # pred_ref  : VMEM (Nb, C, Lp)     flat prediction (valid lanes sliced in wrapper)
        # imroll_ref: VMEM (K2, C, Lp)     scratch: rolled image planes, one per tap
        wmat = w_ref[...]              # (NC, K2)
        wmat_t = wt_ref[...]           # (K2, NC)

        for n in range(Nb):            # Nb is small & static -> unrolled
            stacked = x_ref[n]         # (NC + C, Lp)

            # Pass 1: one roll per tap serves BOTH the depthwise mask conv and
            # the image path (rolled image rows cached in VMEM scratch).
            # NOTE: for large K convert to lax.fori_loop(..., unroll=True);
            #       at K2=9 full unrolling is fine.
            out_mask = jnp.zeros((NC, Lp), jnp.float32)
            for t, s in enumerate(shifts):
                rolled = _roll(stacked, s)
                out_mask = out_mask + wmat[:, t:t + 1] * rolled[:NC]
                imroll_ref[t] = rolled[NC:]

            # wmask[t] = sum_c w[c, t] * out_mask[c]   -- single MXU matmul.
            wmask = jnp.dot(wmat_t, out_mask,
                            preferred_element_type=jnp.float32)   # (K2, Lp)

            # Pass 2: pure VPU FMAs, no rolls:
            #   pred[i] = sum_t shift_t(im[i]) * wmask[t]
            pred = jnp.zeros((C, Lp), jnp.float32)
            for t in range(K2):
                pred = pred + imroll_ref[t] * wmask[t:t + 1]
            pred_ref[n] = pred

    return kernel


def _pick_batch_block(n_batch, per_elem_bytes, budget_bytes=8 << 20):
    """Batch elements per grid step: blocks as big as the budget allows, but
    keep >= 2 grid steps when the batch allows (v7x has 2 TensorCores) and
    divide the batch evenly."""
    nb = max(1, min(n_batch, budget_bytes // max(per_elem_bytes, 1)))
    if n_batch >= 2:
        nb = min(nb, max(1, n_batch // 2))
    while n_batch % nb != 0:
        nb -= 1
    return nb


def pallas_construct_pred(m_mask, im, m_kernel, m_range):
    """pred = construct_image(im, conv2d(m_mask, m_kernel, pad=R, groups=NC), ...)."""
    N, NC, H, W = m_mask.shape
    C = im.shape[1]
    K = m_kernel.shape[-1]
    R = m_range
    Hp, Wp = H + 2 * R, W + 2 * R
    # Lane-dense flat length: padded plane flattened, rounded up to a 128 multiple.
    Lp = max(128, ((Hp * Wp + 127) // 128) * 128)

    # Single pad+reshape chain on the concatenated [m_mask ; image] planes.
    stacked = jnp.concatenate(
        [m_mask.astype(jnp.float32), im.astype(jnp.float32)], axis=1)      # (N, NC+C, H, W)
    sp = jnp.pad(stacked, ((0, 0), (0, 0), (R, R), (R, R)))                # (N, NC+C, Hp, Wp)
    sf = sp.reshape(N, NC + C, Hp * Wp)
    sf = jnp.pad(sf, ((0, 0), (0, 0), (0, Lp - Hp * Wp)))                  # (N, NC+C, Lp)

    wmat = m_kernel.reshape(NC, K * K).astype(jnp.float32)                 # (NC, K2)
    wmat_t = jnp.transpose(wmat)                                           # (K2, NC)

    per_elem_bytes = ((NC + C) + C) * Lp * 4
    Nb = _pick_batch_block(N, per_elem_bytes)
    grid = (N // Nb,)

    kern = _make_kernel(Nb, C, NC, K, Wp, Lp)
    pred_flat = pl.pallas_call(
        kern,
        out_shape=jax.ShapeDtypeStruct((N, C, Lp), jnp.float32),
        grid=grid,
        in_specs=[
            pl.BlockSpec((NC, K * K), lambda b: (0, 0)),           # taps
            pl.BlockSpec((K * K, NC), lambda b: (0, 0)),           # taps, transposed
            pl.BlockSpec((Nb, NC + C, Lp), lambda b: (b, 0, 0)),   # stacked flat planes
        ],
        out_specs=pl.BlockSpec((Nb, C, Lp), lambda b: (b, 0, 0)),
        scratch_shapes=[pltpu.VMEM((K * K, C, Lp), jnp.float32)],  # rolled-image cache
        compiler_params=pltpu.CompilerParams(
            dimension_semantics=("parallel",),   # batch blocks independent (2 TCs on v7x)
        ),
    )(wmat, wmat_t, sf)

    # Un-flatten and drop the halo / lane-pad garbage positions.
    pred = pred_flat[:, :, : Hp * Wp].reshape(N, C, Hp, Wp)[:, :, :H, :W]
    return pred


# ----------------------------------------------------------------------------
# JAX glue reproducing motion2mask / label2mask (vectorized, same semantics).
# ----------------------------------------------------------------------------
def motion2mask(motion, n_class, m_range):
    # motion: (N, 2, H, W) float, values in [-m_range, m_range)
    # (motion == +m_range would index out of range in the PyTorch code too.)
    K = int(math.sqrt(n_class))
    mf = jnp.floor(motion)
    frac = motion - mf
    idx = mf.astype(jnp.int32) + m_range  # (N, 2, H, W)
    a = (jax.nn.one_hot(idx[:, 0], K) * (1.0 - frac[:, 0])[..., None]
         + jax.nn.one_hot(idx[:, 0] + 1, K) * frac[:, 0][..., None])       # (N, H, W, K)
    b = (jax.nn.one_hot(idx[:, 1], K) * (1.0 - frac[:, 1])[..., None]
         + jax.nn.one_hot(idx[:, 1] + 1, K) * frac[:, 1][..., None])       # (N, H, W, K)
    outer = b[..., :, None] * a[..., None, :]                              # ger(b, a)
    N, H, W = motion.shape[0], motion.shape[2], motion.shape[3]
    return outer.reshape(N, H, W, K * K).transpose(0, 3, 1, 2).astype(jnp.float32)


def label2mask(motion, n_class):
    # motion: (N, 1, H, W) integer-valued labels
    return jax.nn.one_hot(motion[:, 0].astype(jnp.int32), n_class, axis=1).astype(jnp.float32)


def gtnet_forward(im_input, im_output, gt_motion, *, m_kernel, im_channel,
                  n_class, m_range, gt_type=None):
    del im_output  # unused by the reference forward as well
    if gt_type == 'label':
        m_mask = label2mask(gt_motion, n_class)
    else:
        m_mask = motion2mask(gt_motion, n_class, m_range)
    im = im_input[:, -im_channel:, :, :]
    pred = pallas_construct_pred(m_mask, im, m_kernel, m_range)
    return pred, m_mask


# ----------------------------------------------------------------------------
# Pure-JAX reference (same math as F.conv2d groups=n_class + construct_image).
# ----------------------------------------------------------------------------
def reference_pred(m_mask, im, m_kernel, m_range):
    N, NC, H, W = m_mask.shape
    K = m_kernel.shape[-1]
    R = m_range
    mm_pad = jnp.pad(m_mask, ((0, 0), (0, 0), (R, R), (R, R)))
    im_pad = jnp.pad(im, ((0, 0), (0, 0), (R, R), (R, R)))
    out_mask = jnp.zeros((N, NC, H, W), jnp.float32)
    for dy in range(K):
        for dx in range(K):
            out_mask = out_mask + (m_kernel[:, 0, dy, dx][None, :, None, None]
                                   * mm_pad[:, :, dy:dy + H, dx:dx + W])
    preds = []
    for i in range(im.shape[1]):
        nearby = jnp.zeros((N, NC, H, W), jnp.float32)
        for dy in range(K):
            for dx in range(K):
                nearby = nearby + (m_kernel[:, 0, dy, dx][None, :, None, None]
                                   * im_pad[:, i:i + 1, dy:dy + H, dx:dx + W])
        preds.append((nearby * out_mask).sum(axis=1))
    return jnp.stack(preds, axis=1)


if __name__ == "__main__":
    key = jax.random.PRNGKey(0)
    N, n_inputs, im_channel = 2, 2, 2
    H = W = 16
    m_range = 1
    K = 2 * m_range + 1
    n_class = K * K  # 9

    k1, k2, k3 = jax.random.split(key, 3)
    im_input = jax.random.normal(k1, (N, n_inputs * im_channel, H, W), jnp.float32)
    im_output = jax.random.normal(k2, (N, im_channel, H, W), jnp.float32)
    # motion in [-m_range, m_range) so floor+1 stays in range (as the PyTorch code requires)
    gt_motion = jax.random.uniform(k3, (N, 2, H, W), jnp.float32,
                                   minval=-float(m_range), maxval=float(m_range) - 1e-2)

    # Deterministic m_kernel in the post-swapaxes layout (n_class, 1, K, K),
    # each depthwise kernel normalized to sum to 1.
    kk = jax.random.uniform(jax.random.PRNGKey(42), (n_class, 1, K, K), jnp.float32)
    m_kernel = kk / kk.sum(axis=(2, 3), keepdims=True)

    pred, m_mask = gtnet_forward(im_input, im_output, gt_motion,
                                 m_kernel=m_kernel, im_channel=im_channel,
                                 n_class=n_class, m_range=m_range)
    jax.block_until_ready((pred, m_mask))

    # Correctness check against the plain-JAX reference of the same semantics.
    pred_ref = reference_pred(m_mask, im_input[:, -im_channel:], m_kernel, m_range)
    np.testing.assert_allclose(np.asarray(pred), np.asarray(pred_ref), rtol=1e-4, atol=1e-4)
    assert pred.shape == (N, im_channel, H, W)
    assert m_mask.shape == (N, n_class, H, W)

    print("KERNEL_OK")
</pallas_src>

<mosaic_0001>
module attributes {stable_mosaic.version = 11 : i64} {
  func.func @kernel(%arg0: i32, %arg1: memref<9x9xf32, #tpu.memory_space<vmem>>, %arg2: memref<9x9xf32, #tpu.memory_space<vmem>>, %arg3: memref<1x11x384xf32, #tpu.memory_space<vmem>>, %arg4: memref<1x2x384xf32, #tpu.memory_space<vmem>>, %arg5: memref<9x2x384xf32, #tpu.memory_space<vmem>>) attributes {dimension_semantics = [#tpu.dimension_semantics<parallel>], iteration_bounds = array<i64: 2>, scalar_prefetch = 0 : i64, scratch_operands = 1 : i64, tpu.core_type = #tpu.core_type<tc>, window_params = [{pipeline_mode = #tpu.pipeline_mode<synchronous>, transform_indices = @transform_0, window_bounds = array<i64: 9, 9>}, {pipeline_mode = #tpu.pipeline_mode<synchronous>, transform_indices = @transform_1, window_bounds = array<i64: 9, 9>}, {transform_indices = @transform_2, window_bounds = array<i64: 1, 11, 384>}, {transform_indices = @transform_3, window_bounds = array<i64: 1, 2, 384>}]} {
    %c0 = arith.constant 0 : index
    %c0_0 = arith.constant 0 : index
    %0 = vector.load %arg1[%c0, %c0_0] : memref<9x9xf32, #tpu.memory_space<vmem>>, vector<9x9xf32>
    %c0_1 = arith.constant 0 : index
    %c0_2 = arith.constant 0 : index
    %1 = vector.load %arg2[%c0_1, %c0_2] : memref<9x9xf32, #tpu.memory_space<vmem>>, vector<9x9xf32>
    %c0_3 = arith.constant 0 : index
    %c0_4 = arith.constant 0 : index
    %c0_5 = arith.constant 0 : index
    %2 = vector.load %arg3[%c0_3, %c0_4, %c0_5] : memref<1x11x384xf32, #tpu.memory_space<vmem>>, vector<1x11x384xf32>
    %3 = vector.shape_cast %2 : vector<1x11x384xf32> to vector<11x384xf32>
    %cst = arith.constant 0.000000e+00 : f32
    %4 = vector.broadcast %cst : f32 to vector<9x384xf32>
    %5 = vector.extract_strided_slice %0 {offsets = [0, 0], sizes = [9, 1], strides = [1, 1]} : vector<9x9xf32> to vector<9x1xf32>
    %6 = vector.extract_strided_slice %3 {offsets = [0, 0], sizes = [9, 384], strides = [1, 1]} : vector<11x384xf32> to vector<9x384xf32>
    %7 = vector.broadcast %5 : vector<9x1xf32> to vector<9x384xf32>
    %8 = arith.mulf %7, %6 : vector<9x384xf32>
    %9 = arith.addf %4, %8 : vector<9x384xf32>
    %10 = vector.extract_strided_slice %3 {offsets = [9, 0], sizes = [2, 384], strides = [1, 1]} : vector<11x384xf32> to vector<2x384xf32>
    %c0_6 = arith.constant 0 : index
    %c0_7 = arith.constant 0 : index
    %c0_8 = arith.constant 0 : index
    %11 = vector.load %arg5[%c0_6, %c0_7, %c0_8] : memref<9x2x384xf32, #tpu.memory_space<vmem>>, vector<1x2x384xf32>
    %12 = vector.shape_cast %11 : vector<1x2x384xf32> to vector<2x384xf32>
    %13 = vector.shape_cast %10 : vector<2x384xf32> to vector<1x2x384xf32>
    tpu.vector_store %arg5[%c0_6, %c0_7, %c0_8], %13 {strides = array<i32>} : memref<9x2x384xf32, #tpu.memory_space<vmem>>, vector<1x2x384xf32>,
    %c383_i32 = arith.constant 383 : i32
    %14 = tpu.dynamic_rotate %3 by %c383_i32 dim 1 : vector<11x384xf32>, i32 -> vector<11x384xf32>
    %15 = vector.extract_strided_slice %0 {offsets = [0, 1], sizes = [9, 1], strides = [1, 1]} : vector<9x9xf32> to vector<9x1xf32>
    %16 = vector.extract_strided_slice %14 {offsets = [0, 0], sizes = [9, 384], strides = [1, 1]} : vector<11x384xf32> to vector<9x384xf32>
    %17 = vector.broadcast %15 : vector<9x1xf32> to vector<9x384xf32>
    %18 = arith.mulf %17, %16 : vector<9x384xf32>
    %19 = arith.addf %9, %18 : vector<9x384xf32>
    %20 = vector.extract_strided_slice %14 {offsets = [9, 0], sizes = [2, 384], strides = [1, 1]} : vector<11x384xf32> to vector<2x384xf32>
    %c1 = arith.constant 1 : index
    %c0_9 = arith.constant 0 : index
    %c0_10 = arith.constant 0 : index
    %21 = vector.load %arg5[%c1, %c0_9, %c0_10] : memref<9x2x384xf32, #tpu.memory_space<vmem>>, vector<1x2x384xf32>
    %22 = vector.shape_cast %21 : vector<1x2x384xf32> to vector<2x384xf32>
    %23 = vector.shape_cast %20 : vector<2x384xf32> to vector<1x2x384xf32>
    tpu.vector_store %arg5[%c1, %c0_9, %c0_10], %23 {strides = array<i32>} : memref<9x2x384xf32, #tpu.memory_space<vmem>>, vector<1x2x384xf32>,
    %c382_i32 = arith.constant 382 : i32
    %24 = tpu.dynamic_rotate %3 by %c382_i32 dim 1 : vector<11x384xf32>, i32 -> vector<11x384xf32>
    %25 = vector.extract_strided_slice %0 {offsets = [0, 2], sizes = [9, 1], strides = [1, 1]} : vector<9x9xf32> to vector<9x1xf32>
    %26 = vector.extract_strided_slice %24 {offsets = [0, 0], sizes = [9, 384], strides = [1, 1]} : vector<11x384xf32> to vector<9x384xf32>
    %27 = vector.broadcast %25 : vector<9x1xf32> to vector<9x384xf32>
    %28 = arith.mulf %27, %26 : vector<9x384xf32>
    %29 = arith.addf %19, %28 : vector<9x384xf32>
    %30 = vector.extract_strided_slice %24 {offsets = [9, 0], sizes = [2, 384], strides = [1, 1]} : vector<11x384xf32> to vector<2x384xf32>
    %c2 = arith.constant 2 : index
    %c0_11 = arith.constant 0 : index
    %c0_12 = arith.constant 0 : index
    %31 = vector.load %arg5[%c2, %c0_11, %c0_12] : memref<9x2x384xf32, #tpu.memory_space<vmem>>, vector<1x2x384xf32>
    %32 = vector.shape_cast %31 : vector<1x2x384xf32> to vector<2x384xf32>
    %33 = vector.shape_cast %30 : vector<2x384xf32> to vector<1x2x384xf32>
    tpu.vector_store %arg5[%c2, %c0_11, %c0_12], %33 {strides = array<i32>} : memref<9x2x384xf32, #tpu.memory_space<vmem>>, vector<1x2x384xf32>,
    %c366_i32 = arith.constant 366 : i32
    %34 = tpu.dynamic_rotate %3 by %c366_i32 dim 1 : vector<11x384xf32>, i32 -> vector<11x384xf32>
    %35 = vector.extract_strided_slice %0 {offsets = [0, 3], sizes = [9, 1], strides = [1, 1]} : vector<9x9xf32> to vector<9x1xf32>
    %36 = vector.extract_strided_slice %34 {offsets = [0, 0], sizes = [9, 384], strides = [1, 1]} : vector<11x384xf32> to vector<9x384xf32>
    %37 = vector.broadcast %35 : vector<9x1xf32> to vector<9x384xf32>
    %38 = arith.mulf %37, %36 : vector<9x384xf32>
    %39 = arith.addf %29, %38 : vector<9x384xf32>
    %40 = vector.extract_strided_slice %34 {offsets = [9, 0], sizes = [2, 384], strides = [1, 1]} : vector<11x384xf32> to vector<2x384xf32>
    %c3 = arith.constant 3 : index
    %c0_13 = arith.constant 0 : index
    %c0_14 = arith.constant 0 : index
    %41 = vector.load %arg5[%c3, %c0_13, %c0_14] : memref<9x2x384xf32, #tpu.memory_space<vmem>>, vector<1x2x384xf32>
    %42 = vector.shape_cast %41 : vector<1x2x384xf32> to vector<2x384xf32>
    %43 = vector.shape_cast %40 : vector<2x384xf32> to vector<1x2x384xf32>
    tpu.vector_store %arg5[%c3, %c0_13, %c0_14], %43 {strides = array<i32>} : memref<9x2x384xf32, #tpu.memory_space<vmem>>, vector<1x2x384xf32>,
    %c365_i32 = arith.constant 365 : i32
    %44 = tpu.dynamic_rotate %3 by %c365_i32 dim 1 : vector<11x384xf32>, i32 -> vector<11x384xf32>
    %45 = vector.extract_strided_slice %0 {offsets = [0, 4], sizes = [9, 1], strides = [1, 1]} : vector<9x9xf32> to vector<9x1xf32>
    %46 = vector.extract_strided_slice %44 {offsets = [0, 0], sizes = [9, 384], strides = [1, 1]} : vector<11x384xf32> to vector<9x384xf32>
    %47 = vector.broadcast %45 : vector<9x1xf32> to vector<9x384xf32>
    %48 = arith.mulf %47, %46 : vector<9x384xf32>
    %49 = arith.addf %39, %48 : vector<9x384xf32>
    %50 = vector.extract_strided_slice %44 {offsets = [9, 0], sizes = [2, 384], strides = [1, 1]} : vector<11x384xf32> to vector<2x384xf32>
    %c4 = arith.constant 4 : index
    %c0_15 = arith.constant 0 : index
    %c0_16 = arith.constant 0 : index
    %51 = vector.load %arg5[%c4, %c0_15, %c0_16] : memref<9x2x384xf32, #tpu.memory_space<vmem>>, vector<1x2x384xf32>
    %52 = vector.shape_cast %51 : vector<1x2x384xf32> to vector<2x384xf32>
    %53 = vector.shape_cast %50 : vector<2x384xf32> to vector<1x2x384xf32>
    tpu.vector_store %arg5[%c4, %c0_15, %c0_16], %53 {strides = array<i32>} : memref<9x2x384xf32, #tpu.memory_space<vmem>>, vector<1x2x384xf32>,
    %c364_i32 = arith.constant 364 : i32
    %54 = tpu.dynamic_rotate %3 by %c364_i32 dim 1 : vector<11x384xf32>, i32 -> vector<11x384xf32>
    %55 = vector.extract_strided_slice %0 {offsets = [0, 5], sizes = [9, 1], strides = [1, 1]} : vector<9x9xf32> to vector<9x1xf32>
    %56 = vector.extract_strided_slice %54 {offsets = [0, 0], sizes = [9, 384], strides = [1, 1]} : vector<11x384xf32> to vector<9x384xf32>
    %57 = vector.broadcast %55 : vector<9x1xf32> to vector<9x384xf32>
    %58 = arith.mulf %57, %56 : vector<9x384xf32>
    %59 = arith.addf %49, %58 : vector<9x384xf32>
    %60 = vector.extract_strided_slice %54 {offsets = [9, 0], sizes = [2, 384], strides = [1, 1]} : vector<11x384xf32> to vector<2x384xf32>
    %c5 = arith.constant 5 : index
    %c0_17 = arith.constant 0 : index
    %c0_18 = arith.constant 0 : index
    %61 = vector.load %arg5[%c5, %c0_17, %c0_18] : memref<9x2x384xf32, #tpu.memory_space<vmem>>, vector<1x2x384xf32>
    %62 = vector.shape_cast %61 : vector<1x2x384xf32> to vector<2x384xf32>
    %63 = vector.shape_cast %60 : vector<2x384xf32> to vector<1x2x384xf32>
    tpu.vector_store %arg5[%c5, %c0_17, %c0_18], %63 {strides = array<i32>} : memref<9x2x384xf32, #tpu.memory_space<vmem>>, vector<1x2x384xf32>,
    %c348_i32 = arith.constant 348 : i32
    %64 = tpu.dynamic_rotate %3 by %c348_i32 dim 1 : vector<11x384xf32>, i32 -> vector<11x384xf32>
    %65 = vector.extract_strided_slice %0 {offsets = [0, 6], sizes = [9, 1], strides = [1, 1]} : vector<9x9xf32> to vector<9x1xf32>
    %66 = vector.extract_strided_slice %64 {offsets = [0, 0], sizes = [9, 384], strides = [1, 1]} : vector<11x384xf32> to vector<9x384xf32>
    %67 = vector.broadcast %65 : vector<9x1xf32> to vector<9x384xf32>
    %68 = arith.mulf %67, %66 : vector<9x384xf32>
    %69 = arith.addf %59, %68 : vector<9x384xf32>
    %70 = vector.extract_strided_slice %64 {offsets = [9, 0], sizes = [2, 384], strides = [1, 1]} : vector<11x384xf32> to vector<2x384xf32>
    %c6 = arith.constant 6 : index
    %c0_19 = arith.constant 0 : index
    %c0_20 = arith.constant 0 : index
    %71 = vector.load %arg5[%c6, %c0_19, %c0_20] : memref<9x2x384xf32, #tpu.memory_space<vmem>>, vector<1x2x384xf32>
    %72 = vector.shape_cast %71 : vector<1x2x384xf32> to vector<2x384xf32>
    %73 = vector.shape_cast %70 : vector<2x384xf32> to vector<1x2x384xf32>
    tpu.vector_store %arg5[%c6, %c0_19, %c0_20], %73 {strides = array<i32>} : memref<9x2x384xf32, #tpu.memory_space<vmem>>, vector<1x2x384xf32>,
    %c347_i32 = arith.constant 347 : i32
    %74 = tpu.dynamic_rotate %3 by %c347_i32 dim 1 : vector<11x384xf32>, i32 -> vector<11x384xf32>
    %75 = vector.extract_strided_slice %0 {offsets = [0, 7], sizes = [9, 1], strides = [1, 1]} : vector<9x9xf32> to vector<9x1xf32>
    %76 = vector.extract_strided_slice %74 {offsets = [0, 0], sizes = [9, 384], strides = [1, 1]} : vector<11x384xf32> to vector<9x384xf32>
    %77 = vector.broadcast %75 : vector<9x1xf32> to vector<9x384xf32>
    %78 = arith.mulf %77, %76 : vector<9x384xf32>
    %79 = arith.addf %69, %78 : vector<9x384xf32>
    %80 = vector.extract_strided_slice %74 {offsets = [9, 0], sizes = [2, 384], strides = [1, 1]} : vector<11x384xf32> to vector<2x384xf32>
    %c7 = arith.constant 7 : index
    %c0_21 = arith.constant 0 : index
    %c0_22 = arith.constant 0 : index
    %81 = vector.load %arg5[%c7, %c0_21, %c0_22] : memref<9x2x384xf32, #tpu.memory_space<vmem>>, vector<1x2x384xf32>
    %82 = vector.shape_cast %81 : vector<1x2x384xf32> to vector<2x384xf32>
    %83 = vector.shape_cast %80 : vector<2x384xf32> to vector<1x2x384xf32>
    tpu.vector_store %arg5[%c7, %c0_21, %c0_22], %83 {strides = array<i32>} : memref<9x2x384xf32, #tpu.memory_space<vmem>>, vector<1x2x384xf32>,
    %c346_i32 = arith.constant 346 : i32
    %84 = tpu.dynamic_rotate %3 by %c346_i32 dim 1 : vector<11x384xf32>, i32 -> vector<11x384xf32>
    %85 = vector.extract_strided_slice %0 {offsets = [0, 8], sizes = [9, 1], strides = [1, 1]} : vector<9x9xf32> to vector<9x1xf32>
    %86 = vector.extract_strided_slice %84 {offsets = [0, 0], sizes = [9, 384], strides = [1, 1]} : vector<11x384xf32> to vector<9x384xf32>
    %87 = vector.broadcast %85 : vector<9x1xf32> to vector<9x384xf32>
    %88 = arith.mulf %87, %86 : vector<9x384xf32>
    %89 = arith.addf %79, %88 : vector<9x384xf32>
    %90 = vector.extract_strided_slice %84 {offsets = [9, 0], sizes = [2, 384], strides = [1, 1]} : vector<11x384xf32> to vector<2x384xf32>
    %c8 = arith.constant 8 : index
    %c0_23 = arith.constant 0 : index
    %c0_24 = arith.constant 0 : index
    %91 = vector.load %arg5[%c8, %c0_23, %c0_24] : memref<9x2x384xf32, #tpu.memory_space<vmem>>, vector<1x2x384xf32>
    %92 = vector.shape_cast %91 : vector<1x2x384xf32> to vector<2x384xf32>
    %93 = vector.shape_cast %90 : vector<2x384xf32> to vector<1x2x384xf32>
    tpu.vector_store %arg5[%c8, %c0_23, %c0_24], %93 {strides = array<i32>} : memref<9x2x384xf32, #tpu.memory_space<vmem>>, vector<1x2x384xf32>,
    %cst_25 = arith.constant dense<0.000000e+00> : vector<9x384xf32>
    %94 = tpu.matmul %1, %89, %cst_25 {dimension_numbers = #tpu.dot_dimension_numbers<[1], [0], [0], [1], [0, 0, 1, 1], [], []>} : vector<9x9xf32>, vector<9x384xf32>, vector<9x384xf32> -> vector<9x384xf32>
    %cst_26 = arith.constant 0.000000e+00 : f32
    %95 = vector.broadcast %cst_26 : f32 to vector<2x384xf32>
    %c0_27 = arith.constant 0 : index
    %c0_28 = arith.constant 0 : index
    %c0_29 = arith.constant 0 : index
    %96 = vector.load %arg5[%c0_27, %c0_28, %c0_29] : memref<9x2x384xf32, #tpu.memory_space<vmem>>, vector<1x2x384xf32>
    %97 = vector.shape_cast %96 : vector<1x2x384xf32> to vector<2x384xf32>
    %98 = vector.extract_strided_slice %94 {offsets = [0, 0], sizes = [1, 384], strides = [1, 1]} : vector<9x384xf32> to vector<1x384xf32>
    %99 = vector.broadcast %98 : vector<1x384xf32> to vector<2x384xf32>
    %100 = arith.mulf %97, %99 : vector<2x384xf32>
    %101 = arith.addf %95, %100 : vector<2x384xf32>
    %c1_30 = arith.constant 1 : index
    %c0_31 = arith.constant 0 : index
    %c0_32 = arith.constant 0 : index
    %102 = vector.load %arg5[%c1_30, %c0_31, %c0_32] : memref<9x2x384xf32, #tpu.memory_space<vmem>>, vector<1x2x384xf32>
    %103 = vector.shape_cast %102 : vector<1x2x384xf32> to vector<2x384xf32>
    %104 = vector.extract_strided_slice %94 {offsets = [1, 0], sizes = [1, 384], strides = [1, 1]} : vector<9x384xf32> to vector<1x384xf32>
    %105 = vector.broadcast %104 : vector<1x384xf32> to vector<2x384xf32>
    %106 = arith.mulf %103, %105 : vector<2x384xf32>
    %107 = arith.addf %101, %106 : vector<2x384xf32>
    %c2_33 = arith.constant 2 : index
    %c0_34 = arith.constant 0 : index
    %c0_35 = arith.constant 0 : index
    %108 = vector.load %arg5[%c2_33, %c0_34, %c0_35] : memref<9x2x384xf32, #tpu.memory_space<vmem>>, vector<1x2x384xf32>
    %109 = vector.shape_cast %108 : vector<1x2x384xf32> to vector<2x384xf32>
    %110 = vector.extract_strided_slice %94 {offsets = [2, 0], sizes = [1, 384], strides = [1, 1]} : vector<9x384xf32> to vector<1x384xf32>
    %111 = vector.broadcast %110 : vector<1x384xf32> to vector<2x384xf32>
    %112 = arith.mulf %109, %111 : vector<2x384xf32>
    %113 = arith.addf %107, %112 : vector<2x384xf32>
    %c3_36 = arith.constant 3 : index
    %c0_37 = arith.constant 0 : index
    %c0_38 = arith.constant 0 : index
    %114 = vector.load %arg5[%c3_36, %c0_37, %c0_38] : memref<9x2x384xf32, #tpu.memory_space<vmem>>, vector<1x2x384xf32>
    %115 = vector.shape_cast %114 : vector<1x2x384xf32> to vector<2x384xf32>
    %116 = vector.extract_strided_slice %94 {offsets = [3, 0], sizes = [1, 384], strides = [1, 1]} : vector<9x384xf32> to vector<1x384xf32>
    %117 = vector.broadcast %116 : vector<1x384xf32> to vector<2x384xf32>
    %118 = arith.mulf %115, %117 : vector<2x384xf32>
    %119 = arith.addf %113, %118 : vector<2x384xf32>
    %c4_39 = arith.constant 4 : index
    %c0_40 = arith.constant 0 : index
    %c0_41 = arith.constant 0 : index
    %120 = vector.load %arg5[%c4_39, %c0_40, %c0_41] : memref<9x2x384xf32, #tpu.memory_space<vmem>>, vector<1x2x384xf32>
    %121 = vector.shape_cast %120 : vector<1x2x384xf32> to vector<2x384xf32>
    %122 = vector.extract_strided_slice %94 {offsets = [4, 0], sizes = [1, 384], strides = [1, 1]} : vector<9x384xf32> to vector<1x384xf32>
    %123 = vector.broadcast %122 : vector<1x384xf32> to vector<2x384xf32>
    %124 = arith.mulf %121, %123 : vector<2x384xf32>
    %125 = arith.addf %119, %124 : vector<2x384xf32>
    %c5_42 = arith.constant 5 : index
    %c0_43 = arith.constant 0 : index
    %c0_44 = arith.constant 0 : index
    %126 = vector.load %arg5[%c5_42, %c0_43, %c0_44] : memref<9x2x384xf32, #tpu.memory_space<vmem>>, vector<1x2x384xf32>
    %127 = vector.shape_cast %126 : vector<1x2x384xf32> to vector<2x384xf32>
    %128 = vector.extract_strided_slice %94 {offsets = [5, 0], sizes = [1, 384], strides = [1, 1]} : vector<9x384xf32> to vector<1x384xf32>
    %129 = vector.broadcast %128 : vector<1x384xf32> to vector<2x384xf32>
    %130 = arith.mulf %127, %129 : vector<2x384xf32>
    %131 = arith.addf %125, %130 : vector<2x384xf32>
    %c6_45 = arith.constant 6 : index
    %c0_46 = arith.constant 0 : index
    %c0_47 = arith.constant 0 : index
    %132 = vector.load %arg5[%c6_45, %c0_46, %c0_47] : memref<9x2x384xf32, #tpu.memory_space<vmem>>, vector<1x2x384xf32>
    %133 = vector.shape_cast %132 : vector<1x2x384xf32> to vector<2x384xf32>
    %134 = vector.extract_strided_slice %94 {offsets = [6, 0], sizes = [1, 384], strides = [1, 1]} : vector<9x384xf32> to vector<1x384xf32>
    %135 = vector.broadcast %134 : vector<1x384xf32> to vector<2x384xf32>
    %136 = arith.mulf %133, %135 : vector<2x384xf32>
    %137 = arith.addf %131, %136 : vector<2x384xf32>
    %c7_48 = arith.constant 7 : index
    %c0_49 = arith.constant 0 : index
    %c0_50 = arith.constant 0 : index
    %138 = vector.load %arg5[%c7_48, %c0_49, %c0_50] : memref<9x2x384xf32, #tpu.memory_space<vmem>>, vector<1x2x384xf32>
    %139 = vector.shape_cast %138 : vector<1x2x384xf32> to vector<2x384xf32>
    %140 = vector.extract_strided_slice %94 {offsets = [7, 0], sizes = [1, 384], strides = [1, 1]} : vector<9x384xf32> to vector<1x384xf32>
    %141 = vector.broadcast %140 : vector<1x384xf32> to vector<2x384xf32>
    %142 = arith.mulf %139, %141 : vector<2x384xf32>
    %143 = arith.addf %137, %142 : vector<2x384xf32>
    %c8_51 = arith.constant 8 : index
    %c0_52 = arith.constant 0 : index
    %c0_53 = arith.constant 0 : index
    %144 = vector.load %arg5[%c8_51, %c0_52, %c0_53] : memref<9x2x384xf32, #tpu.memory_space<vmem>>, vector<1x2x384xf32>
    %145 = vector.shape_cast %144 : vector<1x2x384xf32> to vector<2x384xf32>
    %146 = vector.extract_strided_slice %94 {offsets = [8, 0], sizes = [1, 384], strides = [1, 1]} : vector<9x384xf32> to vector<1x384xf32>
    %147 = vector.broadcast %146 : vector<1x384xf32> to vector<2x384xf32>
    %148 = arith.mulf %145, %147 : vector<2x384xf32>
    %149 = arith.addf %143, %148 : vector<2x384xf32>
    %c0_54 = arith.constant 0 : index
    %c0_55 = arith.constant 0 : index
    %c0_56 = arith.constant 0 : index
    %150 = vector.load %arg4[%c0_54, %c0_55, %c0_56] : memref<1x2x384xf32, #tpu.memory_space<vmem>>, vector<1x2x384xf32>
    %151 = vector.shape_cast %150 : vector<1x2x384xf32> to vector<2x384xf32>
    %152 = vector.shape_cast %149 : vector<2x384xf32> to vector<1x2x384xf32>
    tpu.vector_store %arg4[%c0_54, %c0_55, %c0_56], %152 {strides = array<i32>} : memref<1x2x384xf32, #tpu.memory_space<vmem>>, vector<1x2x384xf32>,
    return
  }
  func.func @transform_0(%arg0: i32) -> (i32, i32) {
    %c0_i32 = arith.constant 0 : i32
    %c0_i32_0 = arith.constant 0 : i32
    %c0_i32_1 = arith.constant 0 : i32
    return %c0_i32, %c0_i32_0 : i32, i32
  }
  func.func @transform_1(%arg0: i32) -> (i32, i32) {
    %c0_i32 = arith.constant 0 : i32
    %c0_i32_0 = arith.constant 0 : i32
    %c0_i32_1 = arith.constant 0 : i32
    return %c0_i32, %c0_i32_0 : i32, i32
  }
  func.func @transform_2(%arg0: i32) -> (i32, i32, i32) {
    %c0_i32 = arith.constant 0 : i32
    %c0_i32_0 = arith.constant 0 : i32
    %c0_i32_1 = arith.constant 0 : i32
    return %arg0, %c0_i32, %c0_i32_0 : i32, i32, i32
  }
  func.func @transform_3(%arg0: i32) -> (i32, i32, i32) {
    %c0_i32 = arith.constant 0 : i32
    %c0_i32_0 = arith.constant 0 : i32
    %c0_i32_1 = arith.constant 0 : i32
    return %arg0, %c0_i32, %c0_i32_0 : i32, i32, i32
  }
}

</mosaic_0001>

<bundles_post_ra>
// kernel: tpu_custom_call.1
= control target key start
LH: loop header
LB: loop body
LE: loop exit
PB: predicated region body
PF: predicated region fallthrough
CT: control target
= control target key end

     0   :  { %8 = vsyncpa [#allocation4], 0  ;;  %s2112_s0 = inlined_call_operand.vmem [shape: f32[9,9], index: 0, kind: input, shape index: {}]   ;;  %s2113_s1 = inlined_call_operand.vmem [shape: f32[9,9], index: 1, kind: input, shape index: {}]   ;;  %s2114_s2 = inlined_call_operand.vmem [shape: f32[2,11,384], index: 2, kind: input, shape index: {}]   ;;  %s2115_s3 = inlined_call_operand.hbm [shape: f32[2,2,384], index: 3, kind: output, shape index: {}]  }
   0x1   :  { %10 = vsyncpa [#allocation4 + $0x1], 0  ;;  %s1553_s12 = smov 0   ;;  %s1555_s13 = smov 0  }
   0x2   :  { %s1557_s14 = smov 0   ;;  %s1559_s15 = smov 0  }
   0x3 LB: > { %s1574_s16 = sadd.s32 4294967295, %s1510_s15   ;;  %s1322_s17 = sadd.s32 4294967294, %s1510_s15   ;;  %s1510_s15 = sphi %s1559_s15, %s2123_s15   ;;  %s1506_s14 = sphi %s1557_s14, %s2122_s14   ;;  %s1502_s13 = sphi %s1555_s13, %s2121_s13   ;;  %s1498_s12 = sphi %s1553_s12, %s2120_s12  }
   0x4   : > { %s1578_s18 = sadd.s32 1, %s1510_s15   ;;  %s91_s19 = sadd.s32 1, %s1506_s14 }
   0x5   : > { %s88_s20 = ssub.s32 %s1510_s15, %s1578_s18  ;;  %p101_p0 = scmp.ne.s32.totalorder %s1506_s14, %s1502_s13 }
   0x6   : > { %p89_p1 = scmp.eq.s32.totalorder %s88_s20, 0  ;;  %p102_p2 = scmp.eq.s32.totalorder %s1574_s16, 1 }
   0x7   : > { %p107_p3 = scmp.ne.s32.totalorder %s1502_s13, %s1498_s12  ;;  %p108_p4 = scmp.eq.s32.totalorder %s1322_s17, 1 }
   0x8   : > { %s1589_s21 = scalar_select %p89_p1, %s1506_s14, %s91_s19  }
   0x9   : > { %p1591_p5 = por %p102_p2, %p101_p0  ;;  %p1595_p6 = por %p108_p4, %p107_p3 }
   0xa   : > { %p1325_p7 = scmp.ge.s32.totalorder %s1510_s15, 1  ;;  %p140_p8 = scmp.lt.s32.totalorder %s1510_s15, 3 }
   0xc   : > { %p141_p9 = pnand %p1325_p7, %p140_p8 }
   0xd   : > { %v1604_v0 = vld [vmem:[%s2112_s0] sm:$0xff] (!%p141_p9)  ;;  %v1512_v1 = vmov (!%p141_p9), 1   ;;  %v1513_v2 = vmov (!%p141_p9), 0   ;;  %p164_p10 = scmp.lt.s32.totalorder (!%p141_p9), %s1574_s16, 1  ;;  %v1612_v3 = vld [vmem:[%s2112_s0 + $0x8] sm:$0x1] (!%p141_p9)  ;;  %v208_v23 = vlaneseq (!%p141_p9) }
   0xe   : > { %144 = sbr.rel (%p141_p9) target bundleno = 550 (0x226), region = 32  ;;  %1432 = vset.pattern.permute.xlu1 (!%p141_p9), %v1512_v1  ;;  %1431 = vset.pattern.permute.xlu0 (!%p141_p9), %v1513_v2  ;;  %v1514_v4 = vmov (!%p141_p9), 2   ;;  %v1515_v5 = vmov (!%p141_p9), 3   ;;  %s1516_s6 = smov (!%p141_p9), 127   ;;  %v1517_v8 = vmov (!%p141_p9), 4   ;;  %v1518_v12 = vmov (!%p141_p9), 5  }
   0xf   : > { %256 = vperm.xlu1 (!%p141_p9), %1432, %v1604_v0   ;;  %181 = vperm.xlu0 (!%p141_p9), %1431, %v1604_v0   ;;  %s1519_s7 = smov (!%p141_p9), 126   ;;  %s1520_s8 = smov (!%p141_p9), 110   ;;  %v1521_v14 = vmov (!%p141_p9), 6   ;;  %v1522_v15 = vmov (!%p141_p9), 7   ;;  %v1525_v16 = vmov (!%p141_p9), 8   ;;  %v1701_v27 = vshrl.u32 (!%p141_p9), %v208_v23, 7 }
  0x10   : > { %s1523_s9 = smov (!%p141_p9), 109   ;;  %s1524_s10 = smov (!%p141_p9), 108   ;;  %v1529_v21 = vmov (!%p141_p9), 1983009808   ;;  %v1703_v28 = vand.u32 (!%p141_p9), 127, %v208_v23  ;;  %vm221_vm1 = vcmask (!%p141_p9), 1040384  }
  0x11   : > { %s1526_s11 = smov (!%p141_p9), 92   ;;  %s1527_s17 = smov (!%p141_p9), 91   ;;  %v206_v22 = vunpack.c.l.s4 (!%p141_p9), %v1529_v21  ;;  %vm222_vm2 = vcmask (!%p141_p9), 1042434   ;;  %vm224_vm4 = vcmask (!%p141_p9), 1044484   ;;  %vm226_vm6 = vcmask (!%p141_p9), 1046534   ;;  %v1732_v45 = vld [vmem:[%s2113_s1] sm:$0xff] (!%p141_p9) }
  0x12   : > { %s1528_s19 = smov (!%p141_p9), 90   ;;  %vm248_vm0 = vcmp.lt.s32.totalorder (!%p141_p9), %v1703_v28, 127  ;;  %vm223_vm3 = vmor (!%p141_p9), %vm221_vm1, %vm222_vm2  ;;  %vm764_vm7 = vcmask (!%p141_p9), 72704   ;;  %v1530_v48 = vmov (!%p141_p9), 0.0   ;;  %vm314_vm9 = vcmp.lt.s32.totalorder (!%p141_p9), %v1703_v28, 126  ;;  %s161_s27 = sand.u32 (!%p141_p9), 1, %s1502_s13  }
  0x13   : > { %260 = vperm.xlu1 (!%p141_p9), %1432, %v1612_v3   ;;  %186 = vperm.xlu0 (!%p141_p9), %1431, %v1612_v3   ;;  %v207_v26 = vunpack.c.0.s8 (!%p141_p9), %v206_v22  ;;  %vm225_vm5 = vmor (!%p141_p9), %vm223_vm3, %vm224_vm4  ;;  %vm380_vm10 = vcmp.lt.s32.totalorder (!%p141_p9), %v1703_v28, 110  ;;  %vm446_vm11 = vcmp.lt.s32.totalorder (!%p141_p9), %v1703_v28, 109  ;;  %vm512_vm12 = vcmp.lt.s32.totalorder (!%p141_p9), %v1703_v28, 108 }
  0x14   : > { %844 = vmatprep.mubr.f32.mxu0 (!%p141_p9), %v1530_v48  ;;  %1354 = vmatprep.mubr.msk.f32.mxu1 (!%p141_p9), %vm764_vm7, %v1732_v45  ;;  %vm1737_vm8 = vmor (!%p141_p9), %vm225_vm5, %vm226_vm6  ;;  %vm578_vm13 = vcmp.lt.s32.totalorder (!%p141_p9), %v1703_v28, 92  ;;  %vm644_vm14 = vcmp.lt.s32.totalorder (!%p141_p9), %v1703_v28, 91  ;;  %vm710_vm15 = vcmp.lt.s32.totalorder (!%p141_p9), %v1703_v28, 90  ;;  %v172_v28 = vld [vmem:[%s2113_s1 + $0x8] sm:$0x1] (!%p141_p9) }
  0x15   : > { %s165_s28 = scalar_select %p164_p10, %s1574_s16, 1  ;;  %v1711_v31 = vsub.s32 %v207_v26, %v1701_v27 }
  0x17   : > { %1434 = vset.pattern.permute.xlu1 %v1514_v4  ;;  %1433 = vset.pattern.permute.xlu0 %v1514_v4  ;;  %s1370_s29 = smul.u32 48, %s165_s28 }
  0x18   : > { %326 = vperm.xlu1 %1434, %v1612_v3   ;;  %322 = vperm.xlu0 %1433, %v1604_v0   ;;  %s1369_s28 = smul.u32 6, %s161_s27 }
  0x19   : > { %s168_s5 = scalar_lea.vmem %s2114_s2, %s1370_s29  ;;  %s1371_s29 = smul.u32 96, %s1574_s16 }
  0x1a   : > { %v1624_v6 = vld [vmem:[%s168_s5 + $0x10] sm:$0xff]  ;;  %v1626_v7 = vld [vmem:[%s168_s5 + $0x8] sm:$0xff]  ;;  %v1630_v9 = vld [vmem:[%s168_s5 + $0x20] sm:$0x7]  ;;  %s163_s30 = scalar_lea.vmem [#allocation3], %s1369_s28 }
  0x1b   : > { %v1634_v10 = vld [vmem:[%s168_s5 + $0x18] sm:$0x7]  ;;  %v1636_v11 = vld [vmem:[%s168_s5 + $0x28] sm:$0x7]  ;;  %v1642_v13 = vld [vmem:[%s168_s5] sm:$0xff]  ;;  %s1263_s4 = sshll.u32 %s163_s30, 4  ;;  %s2070_s4 = int_to_ptr.vmem [resolvable:$true] %s1263_s4 }
  0x1c   : > { %1435 = vset.pattern.permute.xlu1 %v1515_v5  ;;  %1436 = vset.pattern.permute.xlu0 %v1515_v5  ;;  %v204_v35 = vcombine.low %v1634_v10, %v1630_v9  ;;  %v218_v36 = vrot.slane %v1636_v11, %v1711_v31  ;;  %s1448_s16 = scalar_lea.vmem %s2070_s4, 96 }
  0x1d   : > { %388 = vperm.xlu1 %1435, %v1604_v0   ;;  %392 = vperm.xlu0 %1436, %v1612_v3   ;;  %p1449_p11 = scmp.ne.s32.totalorder %s2070_s4, %s1448_s16 }
  0x1e   : > { %v211_v39 = vrot.slane %v204_v35, %v1711_v31 }
  0x1f   : > { %p1450_p12 = pnand %p1449_p11, %p1591_p5 }
  0x20   : > { %v219_v43 = vcombine.low %v211_v39, %v218_v36  ;;  %v220_v44 = vcombine.high %v211_v39, %v218_v36 }
  0x21   : > { %242 = vrot.lane.b32.xlu0 %v1624_v6, %s1516_s6  ;;  %238 = vrot.lane.b32.xlu1 %v1626_v7, %s1516_s6  ;;  %p1451_p13 = pneg %p1450_p12 }
  0x22   : > { %1437 = vset.pattern.permute.xlu0 %v1517_v8  ;;  %1438 = vset.pattern.permute.xlu1 %v1517_v8  ;;  %v1327_v46 = vrot.slane %v219_v43, 9  ;;  %v230_v47 = vrot.slane %v220_v44, 7 }
  0x24   : > { %v231_v54 = vsel %vm1737_vm8, %v1327_v46, %v230_v47 }
  0x25   : > { %454 = vperm.xlu0 %1437, %v1604_v0   ;;  %240 = vrot.lane.b32.xlu1 %v1630_v9, %s1516_s6  ;;  %233 = vst [vmem:[#allocation2] sm:$0x3f] %v231_v54 }
  0x29   : > { %236 = vrot.lane.b32.xlu0 %v1634_v10, %s1516_s6  ;;  %244 = vrot.lane.b32.xlu1 %v1636_v11, %s1516_s6 }
  0x2a   : > { %1440 = vset.pattern.permute.xlu0 %v1518_v12 }
  0x2d   : > { %308 = vrot.lane.b32.xlu0 %v1630_v9, %s1519_s7  ;;  %458 = vperm.xlu1 %1438, %v1612_v3  }
  0x31   : > { %312 = vrot.lane.b32.xlu0 %v1636_v11, %s1519_s7  ;;  %234 = vrot.lane.b32.xlu1 %v1642_v13, %s1516_s6 }
  0x32   : > { %1439 = vset.pattern.permute.xlu1 %v1518_v12 }
  0x35   : > { %524 = vperm.xlu0 %1440, %v1612_v3   ;;  %306 = vrot.lane.b32.xlu1 %v1626_v7, %s1519_s7 }
  0x39   : > { %372 = vrot.lane.b32.xlu0 %v1626_v7, %s1520_s8  ;;  %310 = vrot.lane.b32.xlu1 %v1624_v6, %s1519_s7 }
  0x3a   : > { %1441 = vset.pattern.permute.xlu0 %v1521_v14 }
  0x3d   : > { %376 = vrot.lane.b32.xlu0 %v1624_v6, %s1520_s8  ;;  %520 = vperm.xlu1 %1439, %v1604_v0  }
  0x41   : > { %586 = vperm.xlu0 %1441, %v1604_v0   ;;  %302 = vrot.lane.b32.xlu1 %v1642_v13, %s1519_s7 }
  0x42   : > { %1442 = vset.pattern.permute.xlu1 %v1521_v14 }
  0x45   : > { %370 = vrot.lane.b32.xlu0 %v1634_v10, %s1520_s8  ;;  %304 = vrot.lane.b32.xlu1 %v1634_v10, %s1519_s7  ;;  %s2068_s7 = scalar_lea.hbm %s2115_s3, %s1371_s29 }
  0x46   : > { %1444 = vset.pattern.permute.xlu0 %v1522_v15 }
  0x49   : > { %440 = vrot.lane.b32.xlu0 %v1630_v9, %s1523_s9  ;;  %374 = vrot.lane.b32.xlu1 %v1630_v9, %s1520_s8 }
  0x4d   : > { %444 = vrot.lane.b32.xlu0 %v1636_v11, %s1523_s9  ;;  %378 = vrot.lane.b32.xlu1 %v1636_v11, %s1520_s8 }
  0x51   : > { %656 = vperm.xlu0 %1444, %v1612_v3   ;;  %590 = vperm.xlu1 %1442, %v1612_v3  }
  0x55   : > { %504 = vrot.lane.b32.xlu0 %v1626_v7, %s1524_s10  ;;  %368 = vrot.lane.b32.xlu1 %v1642_v13, %s1520_s8  ;;  %s1249_s8 = scalar_lea.sflag [#allocation4], %s161_s27 }
  0x56   : > { %1445 = vset.pattern.permute.xlu0 %v1525_v16  ;;  %1443 = vset.pattern.permute.xlu1 %v1522_v15 }
  0x59   : > { %508 = vrot.lane.b32.xlu0 %v1624_v6, %s1524_s10  ;;  %438 = vrot.lane.b32.xlu1 %v1626_v7, %s1523_s9 }
  0x5d   : > { %718 = vperm.xlu0 %1445, %v1604_v0   ;;  %442 = vrot.lane.b32.xlu1 %v1624_v6, %s1523_s9 }
  0x61   : > { %652 = vperm.xlu1 %1443, %v1604_v0   ;;  %502 = vrot.lane.b32.xlu0 %v1634_v10, %s1524_s10 }
  0x65   : > { %434 = vrot.lane.b32.xlu1 %v1642_v13, %s1523_s9  ;;  %572 = vrot.lane.b32.xlu0 %v1630_v9, %s1526_s11 }
  0x66   : > { %1446 = vset.pattern.permute.xlu1 %v1525_v16 }
  0x69   : > { %436 = vrot.lane.b32.xlu1 %v1634_v10, %s1523_s9  ;;  %576 = vrot.lane.b32.xlu0 %v1636_v11, %s1526_s11  ;;  %s1532_s9 = smov [#allocation3]  }
  0x6d   : > { %506 = vrot.lane.b32.xlu1 %v1630_v9, %s1524_s10  ;;  %568 = vrot.lane.b32.xlu0 %v1634_v10, %s1526_s11 }
  0x71   : > { %510 = vrot.lane.b32.xlu1 %v1636_v11, %s1524_s10  ;;  %638 = vrot.lane.b32.xlu0 %v1630_v9, %s1527_s17 }
  0x75   : > { %722 = vperm.xlu1 %1446, %v1612_v3   ;;  %642 = vrot.lane.b32.xlu0 %v1636_v11, %s1527_s17 }
  0x79   : > { %634 = vrot.lane.b32.xlu0 %v1634_v10, %s1527_s17  ;;  %500 = vrot.lane.b32.xlu1 %v1642_v13, %s1524_s10  ;;  %s1452_s10 = sshll.u32 %s1532_s9, 4  ;;  %s1453_s10 = int_to_ptr.vmem [resolvable:$false] %s1452_s10 }
  0x7a   : > { %p1455_p0 = scmp.lt.s32.totalorder %s2070_s4, %s1453_s10 }
  0x7d   : > { %704 = vrot.lane.b32.xlu0 %v1630_v9, %s1528_s19  ;;  %570 = vrot.lane.b32.xlu1 %v1626_v7, %s1526_s11 }
  0x81   : > { %708 = vrot.lane.b32.xlu0 %v1636_v11, %s1528_s19  ;;  %574 = vrot.lane.b32.xlu1 %v1624_v6, %s1526_s11 }
  0x85   : > { %700 = vrot.lane.b32.xlu0 %v1634_v10, %s1528_s19  ;;  %566 = vrot.lane.b32.xlu1 %v1642_v13, %s1526_s11  ;;  %s1454_s11 = scalar_lea.vmem %s1453_s10, 192 }
  0x86   : > { %p1456_p1 = scmp.lt.s32.totalorder %s1454_s11, %s1448_s16 }
  0x88   : > { %p1457_p2 = por %p1456_p1, %p1455_p0 }
  0x89   : > { %636 = vrot.lane.b32.xlu1 %v1626_v7, %s1527_s17 }
  0x8a   : > { %p1458_p3 = pnand %p1457_p2, %p1451_p13 }
  0x8d   : > { %640 = vrot.lane.b32.xlu1 %v1624_v6, %s1527_s17 }
  0x8e   : > { %v1690_v17 = vpop.permute.xlu1 %256  ;;  %v1692_v18 = vpop.permute.xlu0 %181 }
  0x8f   : > { %v190_v32 = vmul.f32 %v1692_v18, %v1626_v7  ;;  %v191_v15 = vmul.f32 %v1692_v18, %v1624_v6 }
  0x91   : > { %632 = vrot.lane.b32.xlu1 %v1642_v13, %s1527_s17 }
  0x92   : > { %v261_v19 = vpop.permute.xlu1 %260  ;;  %v187_v20 = vpop.permute.xlu0 %186 }
  0x93   : > { %v192_v50 = vmul.f32 %v187_v20, %v1634_v10  ;;  %v193_v51 = vmul.f32 %v187_v20, %v1630_v9  ;;  %v194_v55 = vmul.f32 %v187_v20, %v1636_v11  ;;  %v189_v9 = vmul.f32 %v1692_v18, %v1642_v13 }
  0x95   : > { %702 = vrot.lane.b32.xlu1 %v1626_v7, %s1528_s19 }
  0x97   : > { %v1696_v24 = vpop.permute.xlu1 %326  ;;  %v1698_v25 = vpop.permute.xlu0 %322 }
  0x99   : > { %706 = vrot.lane.b32.xlu1 %v1624_v6, %s1528_s19 }
  0x9c   : > { %v1705_v29 = vpop.permute.xlu1 %388  ;;  %v1707_v30 = vpop.permute.xlu0 %392 }
  0x9d   : > { %698 = vrot.lane.b32.xlu1 %v1642_v13, %s1528_s19 }
  0xa0   : > { %v243_v33 = vpop.permute.xlu0 %242  ;;  %v239_v34 = vpop.permute.xlu1 %238 }
  0xa1   : > { %v249_v37 = vsel %vm248_vm0, %v239_v34, %v243_v33 }
  0xa2   : > { %v264_v38 = vmul.f32 %v1690_v17, %v249_v37 }
  0xa4   : > { %v1725_v40 = vadd.f32 %v264_v38, %v190_v32  ;;  %v1727_v41 = vpop.permute.xlu0 %454  ;;  %v241_v42 = vpop.permute.xlu1 %240 }
  0xa8   : > { %v237_v52 = vpop.permute.xlu0 %236  ;;  %v245_v53 = vpop.permute.xlu1 %244 }
  0xa9   : > { %v252_v56 = vsel %vm248_vm0, %v237_v52, %v241_v42  ;;  %v250_v57 = vsel %vm248_vm0, %v241_v42, %v245_v53  ;;  %v254_v58 = vsel %vm248_vm0, %v245_v53, %v237_v52 }
  0xaa   : > { %v266_v59 = vmul.f32 %v261_v19, %v252_v56  ;;  %v267_v60 = vmul.f32 %v261_v19, %v250_v57  ;;  %v268_v61 = vmul.f32 %v261_v19, %v254_v58  ;;  %v278_v62 = vcombine.low %v252_v56, %v250_v57 }
  0xab   : > { %v292_v63 = vrot.slane %v254_v58, %v1711_v31 }
  0xac   : > { %v272_v0 = vadd.f32 %v266_v59, %v192_v50  ;;  %v273_v1 = vadd.f32 %v267_v60, %v193_v51  ;;  %v274_v2 = vadd.f32 %v268_v61, %v194_v55  ;;  %v285_v3 = vrot.slane %v278_v62, %v1711_v31  ;;  %v309_v4 = vpop.permute.xlu0 %308  ;;  %v1754_v5 = vpop.permute.xlu1 %458 }
  0xae   : > { %v293_v7 = vcombine.low %v285_v3, %v292_v63  ;;  %v294_v8 = vcombine.high %v285_v3, %v292_v63 }
  0xb0   : > { %v1328_v10 = vrot.slane %v293_v7, 9  ;;  %v297_v11 = vrot.slane %v294_v8, 7  ;;  %v313_v12 = vpop.permute.xlu0 %312  ;;  %v235_v14 = vpop.permute.xlu1 %234 }
  0xb1   : > { %v316_v16 = vsel %vm314_vm9, %v309_v4, %v313_v12  ;;  %v251_v19 = vsel %vm248_vm0, %v235_v14, %v239_v34  ;;  %v253_v20 = vsel %vm248_vm0, %v243_v33, %v235_v14  ;;  %vm1531_vm0 = vmmov 1  }
  0xb2   : > { %v333_v21 = vmul.f32 %v1696_v24, %v316_v16  ;;  %v263_v13 = vmul.f32 %v1690_v17, %v251_v19  ;;  %v265_v22 = vmul.f32 %v1690_v17, %v253_v20  ;;  %v298_v23 = vsel %vm1737_vm8, %v1328_v10, %v297_v11  ;;  %vm1358_vm2 = vmpackc.low %vm221_vm1, %vm1531_vm0 }
  0xb3   : > { %301 = vst [vmem:[#allocation2 + $0x6] sm:$0x3f] %v298_v23 }
  0xb4   : > { %v339_v6 = vadd.f32 %v333_v21, %v273_v1  ;;  %v269_v18 = vadd.f32 %v263_v13, %v189_v9  ;;  %v271_v26 = vadd.f32 %v265_v22, %v191_v15  ;;  %v1772_v32 = vpop.permute.xlu0 %524  ;;  %v307_v35 = vpop.permute.xlu1 %306 }
  0xb8   : > { %v1774_v34 = vpop.permute.xlu0 %372  ;;  %v311_v36 = vpop.permute.xlu1 %310 }
  0xb9   : > { %v315_v33 = vsel %vm314_vm9, %v307_v35, %v311_v36 }
  0xba   : > { %v330_v37 = vmul.f32 %v1698_v25, %v315_v33 }
  0xbc   : > { %v336_v17 = vadd.f32 %v330_v37, %v1725_v40  ;;  %v377_v38 = vpop.permute.xlu0 %376  ;;  %v1781_v39 = vpop.permute.xlu1 %520 }
  0xbd   : > { %v381_v42 = vsel %vm380_vm10, %v1774_v34, %v377_v38 }
  0xbe   : > { %v396_v43 = vmul.f32 %v1705_v29, %v381_v42 }
  0xc0   : > { %v1787_v44 = vadd.f32 %v396_v43, %v336_v17  ;;  %v1789_v46 = vpop.permute.xlu0 %586  ;;  %v303_v47 = vpop.permute.xlu1 %302 }
  0xc1   : > { %v317_v50 = vsel %vm314_vm9, %v303_v47, %v307_v35  ;;  %v319_v40 = vsel %vm314_vm9, %v311_v36, %v303_v47 }
  0xc2   : > { %v329_v51 = vmul.f32 %v1698_v25, %v317_v50  ;;  %v331_v52 = vmul.f32 %v1698_v25, %v319_v40 }
  0xc4   : > { %v335_v53 = vadd.f32 %v329_v51, %v269_v18  ;;  %v337_v54 = vadd.f32 %v331_v52, %v271_v26  ;;  %v371_v55 = vpop.permute.xlu0 %370  ;;  %v305_v56 = vpop.permute.xlu1 %304 }
  0xc5   : > { %v318_v57 = vsel %vm314_vm9, %v305_v56, %v309_v4  ;;  %v320_v58 = vsel %vm314_vm9, %v313_v12, %v305_v56 }
  0xc6   : > { %v332_v59 = vmul.f32 %v1696_v24, %v318_v57  ;;  %v334_v60 = vmul.f32 %v1696_v24, %v320_v58  ;;  %v344_v61 = vcombine.low %v318_v57, %v316_v16  ;;  %v358_v25 = vrot.slane %v320_v58, %v1711_v31 }
  0xc8   : > { %v338_v62 = vadd.f32 %v332_v59, %v272_v0  ;;  %v340_v63 = vadd.f32 %v334_v60, %v274_v2  ;;  %v351_v1 = vrot.slane %v344_v61, %v1711_v31  ;;  %v1805_v3 = vpop.permute.xlu0 %440  ;;  %v375_v7 = vpop.permute.xlu1 %374 }
  0xc9   : > { %v384_v4 = vsel %vm380_vm10, %v371_v55, %v375_v7 }
  0xca   : > { %v359_v8 = vcombine.low %v351_v1, %v358_v25  ;;  %v360_v9 = vcombine.high %v351_v1, %v358_v25  ;;  %v398_v10 = vmul.f32 %v1707_v30, %v384_v4 }
  0xcc   : > { %v1329_v24 = vrot.slane %v359_v8, 9  ;;  %v363_v11 = vrot.slane %v360_v9, 7  ;;  %v404_v0 = vadd.f32 %v398_v10, %v338_v62  ;;  %v445_v2 = vpop.permute.xlu0 %444  ;;  %v379_v12 = vpop.permute.xlu1 %378 }
  0xcd   : > { %v448_v14 = vsel %vm446_vm11, %v1805_v3, %v445_v2  ;;  %v382_v15 = vsel %vm380_vm10, %v375_v7, %v379_v12  ;;  %v386_v16 = vsel %vm380_vm10, %v379_v12, %v371_v55 }
  0xce   : > { %v399_v19 = vmul.f32 %v1707_v30, %v382_v15  ;;  %v400_v20 = vmul.f32 %v1707_v30, %v386_v16  ;;  %v410_v21 = vcombine.low %v384_v4, %v382_v15  ;;  %v465_v13 = vmul.f32 %v1754_v5, %v448_v14 }
  0xcf   : > { %v364_v22 = vsel %vm1737_vm8, %v1329_v24, %v363_v11  ;;  %v424_v35 = vrot.slane %v386_v16, %v1711_v31 }
  0xd0   : > { %v405_v23 = vadd.f32 %v399_v19, %v339_v6  ;;  %v406_v18 = vadd.f32 %v400_v20, %v340_v63  ;;  %v417_v26 = vrot.slane %v410_v21, %v1711_v31  ;;  %v1825_v36 = vpop.permute.xlu0 %656  ;;  %v1827_v33 = vpop.permute.xlu1 %590  ;;  %367 = vst [vmem:[#allocation2 + $0xc] sm:$0x3f] %v364_v22 }
  0xd2   : > { %v425_v37 = vcombine.low %v417_v26, %v424_v35  ;;  %v426_v17 = vcombine.high %v417_v26, %v424_v35  ;;  %v1829_v30 = vadd.f32 %v465_v13, %v405_v23 }
  0xd4   : > { %v1330_v42 = vrot.slane %v425_v37, 9  ;;  %v429_v43 = vrot.slane %v426_v17, 7  ;;  %v1831_v47 = vpop.permute.xlu0 %504  ;;  %v369_v50 = vpop.permute.xlu1 %368 }
  0xd5   : > { %v383_v6 = vsel %vm380_vm10, %v369_v50, %v1774_v34  ;;  %v385_v40 = vsel %vm380_vm10, %v377_v38, %v369_v50 }
  0xd6   : > { %v395_v51 = vmul.f32 %v1705_v29, %v383_v6  ;;  %v397_v52 = vmul.f32 %v1705_v29, %v385_v40  ;;  %v430_v55 = vsel %vm1737_vm8, %v1330_v42, %v429_v43 }
  0xd7   : > { %433 = vst [vmem:[#allocation2 + $0x12] sm:$0x3f] %v430_v55 }
  0xd8   : > { %v401_v56 = vadd.f32 %v395_v51, %v335_v53  ;;  %v403_v57 = vadd.f32 %v397_v52, %v337_v54  ;;  %v1842_v58 = vpop.permute.xlu0 %508  ;;  %v439_v59 = vpop.permute.xlu1 %438 }
  0xd9   : > { %v513_v38 = vsel %vm512_vm12, %v1831_v47, %v1842_v58 }
  0xda   : > { %v528_v53 = vmul.f32 %v1781_v39, %v513_v38 }
  0xdc   : > { %v1845_v60 = vpop.permute.xlu0 %718  ;;  %v443_v34 = vpop.permute.xlu1 %442 }
  0xdd   : > { %v447_v29 = vsel %vm446_vm11, %v439_v59, %v443_v34 }
  0xde   : > { %v462_v61 = vmul.f32 %v1727_v41, %v447_v29 }
  0xe0   : > { %v468_v54 = vadd.f32 %v462_v61, %v1787_v44  ;;  %v503_v62 = vpop.permute.xlu0 %502  ;;  %v1856_v63 = vpop.permute.xlu1 %652 }
  0xe2   : > { %v1858_v1 = vadd.f32 %v528_v53, %v468_v54 }
  0xe4   : > { %v573_v25 = vpop.permute.xlu0 %572  ;;  %v435_v7 = vpop.permute.xlu1 %434 }
  0xe5   : > { %v449_v4 = vsel %vm446_vm11, %v435_v7, %v439_v59  ;;  %v451_v8 = vsel %vm446_vm11, %v443_v34, %v435_v7 }
  0xe6   : > { %v461_v9 = vmul.f32 %v1727_v41, %v449_v4  ;;  %v463_v10 = vmul.f32 %v1727_v41, %v451_v8 }
  0xe8   : > { %v1866_v24 = vadd.f32 %v461_v9, %v401_v56  ;;  %v1868_v44 = vadd.f32 %v463_v10, %v403_v57  ;;  %v577_v11 = vpop.permute.xlu0 %576  ;;  %v437_v12 = vpop.permute.xlu1 %436 }
  0xe9   : > { %v450_v15 = vsel %vm446_vm11, %v437_v12, %v1805_v3  ;;  %v452_v16 = vsel %vm446_vm11, %v445_v2, %v437_v12 }
  0xea   : > { %v464_v19 = vmul.f32 %v1754_v5, %v450_v15  ;;  %v466_v20 = vmul.f32 %v1754_v5, %v452_v16  ;;  %v476_v21 = vcombine.low %v450_v15, %v448_v14  ;;  %v490_v23 = vrot.slane %v452_v16, %v1711_v31 }
  0xeb   : > { %v580_v5 = vsel %vm578_vm13, %v573_v25, %v577_v11 }
  0xec   : > { %v470_v41 = vadd.f32 %v464_v19, %v404_v0  ;;  %v472_v13 = vadd.f32 %v466_v20, %v406_v18  ;;  %v483_v22 = vrot.slane %v476_v21, %v1711_v31  ;;  %v569_v26 = vpop.permute.xlu0 %568  ;;  %v507_v35 = vpop.permute.xlu1 %506  ;;  %v597_v59 = vmul.f32 %v1827_v33, %v580_v5 }
  0xed   : > { %v582_v3 = vsel %vm578_vm13, %v569_v26, %v573_v25  ;;  %v516_v2 = vsel %vm512_vm12, %v503_v62, %v507_v35  ;;  %v584_v0 = vsel %vm578_vm13, %v577_v11, %v569_v26 }
  0xee   : > { %v491_v14 = vcombine.low %v483_v22, %v490_v23  ;;  %v492_v37 = vcombine.high %v483_v22, %v490_v23  ;;  %v608_v18 = vcombine.low %v582_v3, %v580_v5  ;;  %v622_v17 = vrot.slane %v584_v0, %v1711_v31 }
  0xef   : > { %v530_v42 = vmul.f32 %v1772_v32, %v516_v2  ;;  %v596_v6 = vmul.f32 %v1827_v33, %v582_v3 }
  0xf0   : > { %v1331_v43 = vrot.slane %v491_v14, 9  ;;  %v495_v50 = vrot.slane %v492_v37, 7  ;;  %v639_v40 = vpop.permute.xlu0 %638  ;;  %v511_v51 = vpop.permute.xlu1 %510  ;;  %v615_v52 = vrot.slane %v608_v18, %v1711_v31 }
  0xf1   : > { %v536_v55 = vadd.f32 %v530_v42, %v470_v41  ;;  %v514_v56 = vsel %vm512_vm12, %v507_v35, %v511_v51  ;;  %v518_v57 = vsel %vm512_vm12, %v511_v51, %v503_v62 }
  0xf2   : > { %v531_v34 = vmul.f32 %v1772_v32, %v514_v56  ;;  %v532_v38 = vmul.f32 %v1772_v32, %v518_v57  ;;  %v542_v29 = vcombine.low %v516_v2, %v514_v56  ;;  %v623_v61 = vcombine.low %v615_v52, %v622_v17 }
  0xf3   : > { %v624_v53 = vcombine.high %v615_v52, %v622_v17  ;;  %v602_v54 = vadd.f32 %v596_v6, %v536_v55  ;;  %v496_v25 = vsel %vm1737_vm8, %v1331_v43, %v495_v50  ;;  %v556_v62 = vrot.slane %v518_v57, %v1711_v31 }
  0xf4   : > { %v537_v7 = vadd.f32 %v531_v34, %v1829_v30  ;;  %v538_v4 = vadd.f32 %v532_v38, %v472_v13  ;;  %v549_v8 = vrot.slane %v542_v29, %v1711_v31  ;;  %v643_v9 = vpop.permute.xlu0 %642  ;;  %v1905_v10 = vpop.permute.xlu1 %722  ;;  %499 = vst [vmem:[#allocation2 + $0x18] sm:$0x3f] %v496_v25  ;;  %v598_v32 = vmul.f32 %v1827_v33, %v584_v0 }
  0xf5   : > { %v1333_v11 = vrot.slane %v623_v61, 9  ;;  %v627_v12 = vrot.slane %v624_v53, 7  ;;  %v646_v15 = vsel %vm644_vm14, %v639_v40, %v643_v9 }
  0xf6   : > { %v557_v16 = vcombine.low %v549_v8, %v556_v62  ;;  %v558_v19 = vcombine.high %v549_v8, %v556_v62  ;;  %v603_v20 = vadd.f32 %v597_v59, %v537_v7  ;;  %v663_v30 = vmul.f32 %v1825_v36, %v646_v15 }
  0xf7   : > { %v604_v21 = vadd.f32 %v598_v32, %v538_v4  ;;  %v628_v41 = vsel %vm1737_vm8, %v1333_v11, %v627_v12 }
  0xf8   : > { %v1332_v13 = vrot.slane %v557_v16, 9  ;;  %v561_v22 = vrot.slane %v558_v19, 7  ;;  %v1913_v23 = vadd.f32 %v663_v30, %v603_v20  ;;  %v635_v26 = vpop.permute.xlu0 %634  ;;  %v501_v33 = vpop.permute.xlu1 %500  ;;  %631 = vst [vmem:[#allocation2 + $0x24] sm:$0x3f] %v628_v41 }
  0xf9   : > { %v648_v35 = vsel %vm644_vm14, %v635_v26, %v639_v40  ;;  %v650_v3 = vsel %vm644_vm14, %v643_v9, %v635_v26  ;;  %v515_v2 = vsel %vm512_vm12, %v501_v33, %v1831_v47  ;;  %v517_v5 = vsel %vm512_vm12, %v1842_v58, %v501_v33 }
  0xfa   : > { %v662_v14 = vmul.f32 %v1825_v36, %v648_v35  ;;  %v664_v37 = vmul.f32 %v1825_v36, %v650_v3  ;;  %v674_v0 = vcombine.low %v648_v35, %v646_v15  ;;  %v688_v18 = vrot.slane %v650_v3, %v1711_v31 }
  0xfb   : > { %v527_v17 = vmul.f32 %v1781_v39, %v515_v2  ;;  %v529_v42 = vmul.f32 %v1781_v39, %v517_v5  ;;  %v562_v43 = vsel %vm1737_vm8, %v1332_v13, %v561_v22 }
  0xfc   : > { %v1932_v50 = vadd.f32 %v662_v14, %v602_v54  ;;  %v1934_v47 = vadd.f32 %v664_v37, %v604_v21  ;;  %v681_v58 = vrot.slane %v674_v0, %v1711_v31  ;;  %v705_v6 = vpop.permute.xlu0 %704  ;;  %v571_v40 = vpop.permute.xlu1 %570  ;;  %565 = vst [vmem:[#allocation2 + $0x1e] sm:$0x3f] %v562_v43 }
  0xfd   : > { %v533_v36 = vadd.f32 %v527_v17, %v1866_v24  ;;  %v535_v51 = vadd.f32 %v529_v42, %v1868_v44 }
  0xfe   : > { %v689_v52 = vcombine.low %v681_v58, %v688_v18  ;;  %v690_v55 = vcombine.high %v681_v58, %v688_v18 }
 0x100   : > { %v1334_v56 = vrot.slane %v689_v52, 9  ;;  %v693_v39 = vrot.slane %v690_v55, 7  ;;  %v709_v57 = vpop.permute.xlu0 %708  ;;  %v575_v59 = vpop.permute.xlu1 %574 }
 0x101   : > { %v712_v61 = vsel %vm710_vm15, %v705_v6, %v709_v57  ;;  %v579_v15 = vsel %vm578_vm13, %v571_v40, %v575_v59 }
 0x102   : > { %v694_v34 = vsel %vm1737_vm8, %v1334_v56, %v693_v39  ;;  %v594_v19 = vmul.f32 %v1789_v46, %v579_v15  ;;  %v729_v13 = vmul.f32 %v1905_v10, %v712_v61 }
 0x103   : > { %697 = vst [vmem:[#allocation2 + $0x2a] sm:$0x3f] %v694_v34  ;;  %v1075_v34 = vsub.s32 4, %v1701_v27 }
 0x104   : > { %v701_v38 = vpop.permute.xlu0 %700  ;;  %v567_v29 = vpop.permute.xlu1 %566  ;;  %v600_v33 = vadd.f32 %v594_v19, %v1858_v1  ;;  %v735_v17 = vadd.f32 %v729_v13, %v1913_v23 }
 0x105   : > { %v714_v24 = vsel %vm710_vm15, %v701_v38, %v705_v6  ;;  %v716_v44 = vsel %vm710_vm15, %v709_v57, %v701_v38  ;;  %v581_v20 = vsel %vm578_vm13, %v567_v29, %v571_v40  ;;  %v583_v21 = vsel %vm578_vm13, %v575_v59, %v567_v29 }
 0x106   : > { %v740_v53 = vcombine.low %v714_v24, %v712_v61  ;;  %v754_v54 = vrot.slane %v716_v44, %v1711_v31  ;;  %v593_v22 = vmul.f32 %v1789_v46, %v581_v20  ;;  %v595_v35 = vmul.f32 %v1789_v46, %v583_v21 }
 0x107   : > { %v728_v42 = vmul.f32 %v1905_v10, %v714_v24  ;;  %v730_v1 = vmul.f32 %v1905_v10, %v716_v44  ;;  %v1110_v38 = vsub.s32 5, %v1701_v27  ;;  %v935_v29 = vsub.s32 0, %v1701_v27 }
 0x108   : > { %v747_v25 = vrot.slane %v740_v53, %v1711_v31  ;;  %v637_v7 = vpop.permute.xlu1 %636  ;;  %v599_v18 = vadd.f32 %v593_v22, %v533_v36  ;;  %v601_v43 = vadd.f32 %v595_v35, %v535_v51 }
 0x109   : > { %v734_v10 = vadd.f32 %v728_v42, %v1932_v50  ;;  %v736_v39 = vadd.f32 %v730_v1, %v1934_v47  ;;  %v1005_v50 = vsub.s32 2, %v1701_v27  ;;  %v1040_v47 = vsub.s32 3, %v1701_v27 }
 0x10a   : > { %v755_v4 = vcombine.low %v747_v25, %v754_v54  ;;  %v756_v8 = vcombine.high %v747_v25, %v754_v54  ;;  %v2012_v25 = vsub.s32 7, %v1701_v27 }
 0x10c   : > { %v1335_v62 = vrot.slane %v755_v4, 9  ;;  %v759_v9 = vrot.slane %v756_v8, 7  ;;  %v641_v32 = vpop.permute.xlu1 %640 }
 0x10d   : > { %v645_v16 = vsel %vm644_vm14, %v637_v7, %v641_v32 }
 0x10e   : > { %v760_v11 = vsel %vm1737_vm8, %v1335_v62, %v759_v9  ;;  %v660_v49 = vmul.f32 %v1856_v63, %v645_v16 }
 0x10f   : > { %763 = vst [vmem:[#allocation2 + $0x30] sm:$0x3f] %v760_v11 }
 0x110   : > { %v633_v12 = vpop.permute.xlu1 %632  ;;  %v666_v14 = vadd.f32 %v660_v49, %v600_v33 }
 0x111   : > { %v647_v41 = vsel %vm644_vm14, %v633_v12, %v637_v7  ;;  %v649_v26 = vsel %vm644_vm14, %v641_v32, %v633_v12 }
 0x112   : > { %v659_v2 = vmul.f32 %v1856_v63, %v647_v41  ;;  %v661_v37 = vmul.f32 %v1856_v63, %v649_v26 }
 0x114   : > { %v703_v30 = vpop.permute.xlu1 %702  ;;  %v665_v6 = vadd.f32 %v659_v2, %v599_v18  ;;  %v667_v63 = vadd.f32 %v661_v37, %v601_v43 }
 0x118   : > { %v707_v3 = vpop.permute.xlu1 %706 }
 0x119   : > { %v711_v5 = vsel %vm710_vm15, %v703_v30, %v707_v3 }
 0x11a   : > { %v726_v0 = vmul.f32 %v1845_v60, %v711_v5 }
 0x11c   : > { %v699_v46 = vpop.permute.xlu1 %698  ;;  %v732_v58 = vadd.f32 %v726_v0, %v666_v14 }
 0x11d   : > { %v713_v40 = vsel %vm710_vm15, %v699_v46, %v703_v30  ;;  %v715_v52 = vsel %vm710_vm15, %v707_v3, %v699_v46 }
 0x11e   : > { %v725_v23 = vmul.f32 %v1845_v60, %v713_v40  ;;  %v727_v36 = vmul.f32 %v1845_v60, %v715_v52  ;;  %v1357_v55 = vpack.c.bf16 %v735_v17, %v732_v58  ;;  %v970_v60 = vsub.s32 1, %v1701_v27 }
 0x120   : > { %v731_v51 = vadd.f32 %v725_v23, %v665_v6  ;;  %1359 = vmatprep.subr.msk.bf16.mxu0 %vm1358_vm2, %v1357_v55  ;;  %v733_v56 = vadd.f32 %v727_v36, %v667_v63  ;;  %v932_v6 = vld [vmem:[#allocation2] sm:$0x3f]  ;;  %v967_v63 = vld [vmem:[#allocation2 + $0x6] sm:$0x3f] }
 0x122   : > { %v1360_v57 = vpack.c.bf16 %v734_v10, %v731_v51  ;;  %v1363_v59 = vpack.c.bf16 %v736_v39, %v733_v56 }
 0x124   : > { %1362 = vmatpush1.bf16.msk.msra.mxu0 %vm1358_vm2, %v1360_v57  ;;  %1365 = vmatprep.subr.msk.bf16.mxu1 %vm1358_vm2, %v1363_v59 }
 0x125   : > { %1368 = vmatpush3.bf16.msk.msra.mxu1 %vm1358_vm2, %v1363_v59  ;;  %v1002_v59 = vld [vmem:[#allocation2 + $0xc] sm:$0x3f] }
 0x127   : > { %1338 = vmatmul.mubr.msk.f32.vlgmr.msra.gmra.mrb[0].mxu0 %vm764_vm7, %v1732_v45  ;;  %v2004_v45 = vsub.s32 6, %v1701_v27 }
 0x128   : > { %1355 = vmatmul.mubr.msk.f32.vlgmr.msra.gmra.mrb[0].mxu1 %vm764_vm7, %v172_v28  ;;  %850 = vmatprep.mubr.f32.mxu0 %v1530_v48 }
 0x12b   : > { %1339 = vmatmul.mubr.msk.f32.gmra.mrb[2].mxu0 %vm764_vm7, %v172_v28 }
 0x1fa   : > { %v2001_v61 = vpop.f32.mrb[0].mxu0 }
 0x1fb   : > { %v971_v48 = vrot.slane %v2001_v61, %v970_v60  ;;  %v1006_v24 = vrot.slane %v2001_v61, %v1005_v50  ;;  %v1041_v44 = vrot.slane %v2001_v61, %v1040_v47  ;;  %v2009_v53 = vpop.f32.mrb[1].mxu0  ;;  %v1356_v54 = vpop.f32.mrb[0].mxu1  ;;  %v1076_v7 = vrot.slane %v2001_v61, %v1075_v34 }
 0x1fc   : > { %v975_v4 = vrot.slane %v2009_v53, %v970_v60  ;;  %v1010_v8 = vrot.slane %v2009_v53, %v1005_v50  ;;  %v1045_v62 = vrot.slane %v2009_v53, %v1040_v47  ;;  %v2018_v9 = vpop.f32.mrb[1].mxu1  ;;  %v1111_v32 = vrot.slane %v2001_v61, %v1110_v38 }
 0x1fd   : > { %v1080_v11 = vrot.slane %v2009_v53, %v1075_v34  ;;  %v1115_v12 = vrot.slane %v2009_v53, %v1110_v38  ;;  %v936_v15 = vrot.slane %v2001_v61, %v935_v29  ;;  %v940_v20 = vrot.slane %v2009_v53, %v935_v29 }
 0x1fe   : > { %v983_v27 = vcombine.low %v971_v48, %v975_v4  ;;  %v1018_v16 = vcombine.low %v1006_v24, %v1010_v8  ;;  %v1053_v19 = vcombine.low %v1041_v44, %v1045_v62  ;;  %v852_v30 = vpop.f32.mrb[2].mxu0  ;;  %v1224_v21 = vrot.slane %v1356_v54, %v935_v29  ;;  %v1037_v54 = vld [vmem:[#allocation2 + $0x12] sm:$0x3f] }
 0x1ff   : > { %v944_v49 = vrot.slane %v2018_v9, %v935_v29  ;;  %v979_v41 = vrot.slane %v2018_v9, %v970_v60  ;;  %v1014_v13 = vrot.slane %v2018_v9, %v1005_v50  ;;  %v854_v22 = vpop.f32.mrb[3].mxu0  ;;  %v948_v26 = vcombine.low %v936_v15, %v940_v20  ;;  %v1072_v15 = vld [vmem:[#allocation2 + $0x18] sm:$0x3f] }
 0x200   : > { %v990_v33 = vrot.slane %v983_v27, %v1711_v31  ;;  %v1025_v35 = vrot.slane %v1018_v16, %v1711_v31  ;;  %v1049_v3 = vrot.slane %v2018_v9, %v1040_v47  ;;  %v1084_v37 = vrot.slane %v2018_v9, %v1075_v34 }
 0x201   : > { %v962_v2 = vrot.slane %v944_v49, %v1711_v31  ;;  %v997_v5 = vrot.slane %v979_v41, %v1711_v31  ;;  %v1032_v14 = vrot.slane %v1014_v13, %v1711_v31  ;;  %v955_v0 = vrot.slane %v948_v26, %v1711_v31  ;;  %v1142_v13 = vld [vmem:[#allocation2 + $0x24] sm:$0x3f]  ;;  %v1177_v26 = vld [vmem:[#allocation2 + $0x2a] sm:$0x3f] }
 0x202   : > { %v1067_v18 = vrot.slane %v1049_v3, %v1711_v31  ;;  %v1119_v17 = vrot.slane %v2018_v9, %v1110_v38  ;;  %v1154_v42 = vrot.slane %v2018_v9, %v2004_v45  ;;  %v1102_v46 = vrot.slane %v1084_v37, %v1711_v31  ;;  %v1212_v3 = vld [vmem:[#allocation2 + $0x30] sm:$0x3f] }
 0x203   : > { %v998_v1 = vcombine.low %v990_v33, %v997_v5  ;;  %v1033_v43 = vcombine.low %v1025_v35, %v1032_v14  ;;  %v1216_v58 = vrot.slane %v852_v30, %v935_v29  ;;  %v963_v40 = vcombine.low %v955_v0, %v962_v2  ;;  %v1107_v30 = vld [vmem:[#allocation2 + $0x1e] sm:$0x3f] }
 0x204   : > { %v1220_v52 = vrot.slane %v854_v22, %v935_v29  ;;  %v1060_v23 = vrot.slane %v1053_v19, %v1711_v31  ;;  %v1088_v36 = vcombine.low %v1076_v7, %v1080_v11  ;;  %v1242_v55 = vrot.slane %v1224_v21, %v1711_v31 }
 0x205   : > { %v1000_v10 = vmul.f32 %v998_v1, %v967_v63  ;;  %v1123_v51 = vcombine.low %v1111_v32, %v1115_v12  ;;  %v1137_v56 = vrot.slane %v1119_v17, %v1711_v31  ;;  %v965_v57 = vmul.f32 %v963_v40, %v932_v6 }
 0x206   : > { %v1228_v39 = vcombine.low %v1216_v58, %v1220_v52  ;;  %v1068_v28 = vcombine.low %v1060_v23, %v1067_v18  ;;  %v1095_v60 = vrot.slane %v1088_v36, %v1711_v31  ;;  %v1035_v50 = vmul.f32 %v1033_v43, %v1002_v59 }
 0x207   : > { %v1130_v47 = vrot.slane %v1123_v51, %v1711_v31  ;;  %v1146_v34 = vrot.slane %v2001_v61, %v2004_v45  ;;  %v1150_v38 = vrot.slane %v2009_v53, %v2004_v45  ;;  %v1001_v48 = vadd.f32 %v1000_v10, %v965_v57 }
 0x208   : > { %v1235_v29 = vrot.slane %v1228_v39, %v1711_v31  ;;  %v1103_v24 = vcombine.low %v1095_v60, %v1102_v46  ;;  %v1172_v44 = vrot.slane %v1154_v42, %v1711_v31  ;;  %v1181_v8 = vrot.slane %v2001_v61, %v2012_v25 }
 0x209   : > { %v1138_v7 = vcombine.low %v1130_v47, %v1137_v56  ;;  %v1158_v4 = vcombine.low %v1146_v34, %v1150_v38  ;;  %v1185_v62 = vrot.slane %v2009_v53, %v2012_v25  ;;  %v1036_v11 = vadd.f32 %v1035_v50, %v1001_v48 }
 0x20a   : > { %v1243_v32 = vcombine.low %v1235_v29, %v1242_v55  ;;  %v1070_v45 = vmul.f32 %v1068_v28, %v1037_v54  ;;  %v1189_v12 = vrot.slane %v2018_v9, %v2012_v25  ;;  %v1105_v20 = vmul.f32 %v1103_v24, %v1072_v15 }
 0x20b   : > { %v1165_v27 = vrot.slane %v1158_v4, %v1711_v31  ;;  %v1193_v16 = vcombine.low %v1181_v8, %v1185_v62  ;;  %v1140_v41 = vmul.f32 %v1138_v7, %v1107_v30 }
 0x20c   : > { %v1071_v19 = vadd.f32 %v1070_v45, %v1036_v11  ;;  %v1207_v61 = vrot.slane %v1189_v12, %v1711_v31  ;;  %v1245_v5 = vmul.f32 %v1243_v32, %v1212_v3 }
 0x20d   : > { %v1173_v21 = vcombine.low %v1165_v27, %v1172_v44  ;;  %v1200_v53 = vrot.slane %v1193_v16, %v1711_v31 }
 0x20e   : > { %v1106_v49 = vadd.f32 %v1105_v20, %v1071_v19 }
 0x20f   : > { %v1208_v22 = vcombine.low %v1200_v53, %v1207_v61  ;;  %v1175_v9 = vmul.f32 %v1173_v21, %v1142_v13 }
 0x210   : > { %v1141_v25 = vadd.f32 %v1140_v41, %v1106_v49 }
 0x211   : > { %v1210_v35 = vmul.f32 %v1208_v22, %v1177_v26 }
 0x212   : > { %v1176_v33 = vadd.f32 %v1175_v9, %v1141_v25 }
 0x214   : > { %v1211_v2 = vadd.f32 %v1210_v35, %v1176_v33 }
 0x216   : > { %v1246_v14 = vadd.f32 %v1245_v5, %v1211_v2 }
 0x218   : > { %1247 = vst [vmem:[%s163_s30] sm:$0x3f] %v1246_v14 }
 0x219   : > { %1461 = shalt.err (!%p1458_p3)
}
 0x21a   : > { %s1462_s17 = scalar_lea.hbm %s2068_s7, 96  ;;  %s1466_s24 = scalar_lea.hbm %s2115_s3, 192 }
 0x21b   : > { %p1463_p4 = scmp.ne.s32.totalorder %s2068_s7, %s1462_s17  ;;  %p1467_p9 = scmp.lt.u32.totalorder %s2068_s7, %s2115_s3 }
 0x21c   : > { %p1468_p10 = scmp.lt.u32.totalorder %s1466_s24, %s1462_s17  ;;  %p1470_p12 = scmp.lt.u32.totalorder %s1462_s17, %s2068_s7 }
 0x21d   : > { %p1464_p7 = pnand %p1463_p4, %p1591_p5 }
 0x21e   : > { %p1469_p11 = por %p1468_p10, %p1467_p9 }
 0x21f   : > { %p1465_p8 = pneg %p1464_p7 }
 0x220   : > { %p1471_p13 = por %p1470_p12, %p1469_p11 }
 0x222   : > { %p1472_p0 = pnand %p1471_p13, %p1465_p8 }
 0x224   : > { %1475 = shalt.err (!%p1472_p0)
}
 0x225   : > { %1372 = dma.vmem_to_hbm [thread:$0]  (%p1591_p5), %s2070_s4, 96, %s2068_s7, %s1249_s8  }
 0x226 PF: > { %p1378_p1 = scmp.ge.s32.totalorder %s1510_s15, 2  ;;  %s1275_s27 = sand.u32 1, %s1498_s12  }
 0x227   : > { %s1276_s28 = scalar_lea.sflag [#allocation4], %s1275_s27 }
 0x228   : > { %p1375_p2 = pnand %p1378_p1, %p1595_p6 }
 0x22a   : > { %1493 = dma.done.wait (!%p1375_p2), %s1276_s28, 96  }
 0x22b   : > { %1495 = vsyncadd (!%p1375_p2), %s1276_s28, 4294967200  ;;  %p13_p3 = scmp.ge.s32.totalorder %s1578_s18, 4   ;;  %s2120_s12 = smov %s1502_s13 }
 0x22c   : > { %s2121_s13 = smov %s1506_s14  ;;  %s2122_s14 = smov %s1589_s21 }
 0x22d   : > { %s2123_s15 = smov %s1578_s18  ;;  %15 = sbr.rel (!%p13_p3) target bundleno = 3 (0x3), region = 75 }
 0x234   :  { %1281 = vsyncpa [#allocation4], 1 }
 0x235   :  { %1283 = vsyncpa [#allocation4 + $0x1], 1 }

</bundles_post_ra>
